<compile_context>
chip_gen: v5e
topology: v5e:2x2
jax: 0.10.0
libtpu: 0.0.40
codegen_flags: <defaults>
</compile_context>

<pallas_src>
import jax
import jax.numpy as jnp
from jax.experimental import pallas as pl
from jax.experimental.pallas import tpu as pltpu


def _round_up(x, m):
    return ((x + m - 1) // m) * m


# --------------------------------------------------------------------------------------
# Tiled dense kernel:  o = x @ w + b   (used for the hoisted input-side gate projection).
# Grid over M row tiles ("parallel"); K and N blocks are full-extent (N is lane-dense,
# a multiple of 128 by construction).
# --------------------------------------------------------------------------------------
def _linear_kernel(x_ref, w_ref, b_ref, o_ref):
    o_ref[...] = (jnp.dot(x_ref[...], w_ref[...],
                          preferred_element_type=jnp.float32)
                  + b_ref[...]).astype(o_ref.dtype)


def linear_pallas(x, w, b, *, tm=256, out_dtype=jnp.float32):
    """x: (M, K), w: (K, N), b: (1, N) -> (M, N)."""
    M, K = x.shape
    N = w.shape[1]
    tm = min(tm, M)                       # v7x: use ~half this tile
    Mp = _round_up(M, tm)
    if Mp != M:
        x = jnp.pad(x, ((0, Mp - M), (0, 0)))
    out = pl.pallas_call(
        _linear_kernel,
        out_shape=jax.ShapeDtypeStruct((Mp, N), out_dtype),
        grid_spec=pltpu.PrefetchScalarGridSpec(
            num_scalar_prefetch=0,
            grid=(Mp // tm,),
            in_specs=[pl.BlockSpec((tm, K), lambda i: (i, 0)),
                      pl.BlockSpec((K, N), lambda i: (0, 0)),
                      pl.BlockSpec((1, N), lambda i: (0, 0))],
            out_specs=pl.BlockSpec((tm, N), lambda i: (i, 0))),
        compiler_params=pltpu.CompilerParams(
            dimension_semantics=("parallel",)),
    )(x, w, b)
    return out[:M] if Mp != M else out


# --------------------------------------------------------------------------------------
# GRU recurrence kernel (grid over T-chunks, h carried in the resident output block).
#   mlen_ref : scalar prefetch (SMEM), (1,) int32 = max(seq_lens)
#   gi_ref   : (Tc, Bp, 3Hp)  chunk of precomputed input-side gates, gate order [r|z|n]
#              (b_hr / b_hz already folded in)
#   lens_ref : (Bp, 1) int32  sequence lengths (pack_padded mask computed in-kernel)
#   wh_ref   : (Hp, 3Hp)      fused hidden-side weights [W_hr|W_hz|W_hn]^T
#   bhn_ref  : (1, Hp)        hidden-side bias of the n gate (must stay inside r*(.))
#   wout_ref : (Hp, Cp)       classifier weights (zero-padded)
#   bout_ref : (1, Cp)        classifier bias
#   h_ref    : (Bp, Hp)       final hidden (also the cross-chunk carry; out block resident)
#   logit_ref: (Bp, Cp)       classifier logits (written on the last grid step)
# --------------------------------------------------------------------------------------
def gru_recurrence_kernel(mlen_ref, gi_ref, lens_ref, wh_ref, bhn_ref,
                          wout_ref, bout_ref, h_ref, logit_ref):
    i = pl.program_id(0)
    Tc, Bp, three_hp = gi_ref.shape
    Hp = three_hp // 3

    @pl.when(i == 0)
    def _():
        h_ref[...] = jnp.zeros_like(h_ref)

    chunk_start = i * Tc
    max_len = mlen_ref[0]

    # Skip chunks that are entirely beyond the longest sequence.
    @pl.when(chunk_start < max_len)
    def _():
        lens = lens_ref[...]                                    # (Bp, 1) int32
        bhn_b = jnp.broadcast_to(bhn_ref[...], (Bp, Hp))        # hoisted broadcast

        def step(t, h):
            gi = gi_ref[t]                                      # (Bp, 3Hp)
            # One fused MXU dot per step; wh_ref[...] read in-place (no vreg hoist).
            gh = jnp.dot(h, wh_ref[...], preferred_element_type=jnp.float32)
            # PyTorch GRU cell (gate order r, z, n); 128-aligned static lane slices.
            r = jax.nn.sigmoid(gi[:, 0:Hp] + gh[:, 0:Hp])
            z = jax.nn.sigmoid(gi[:, Hp:2 * Hp] + gh[:, Hp:2 * Hp])
            n = jnp.tanh(gi[:, 2 * Hp:] + r * (gh[:, 2 * Hp:] + bhn_b))
            h_new = (1.0 - z) * n + z * h
            # pack_padded_sequence: only advance h while t < seq_lens[b] (blend, no select).
            m = ((chunk_start + t) < lens).astype(jnp.float32)  # (Bp, 1)
            return h + m * (h_new - h)

        h_ref[...] = jax.lax.fori_loop(0, Tc, step, h_ref[...], unroll=2)

    # Fused classifier epilogue on the last grid step.
    @pl.when(i == pl.num_programs(0) - 1)
    def _():
        h = h_ref[...]
        logit_ref[...] = (jnp.dot(h, wout_ref[...], preferred_element_type=jnp.float32)
                          + bout_ref[...])


def gru_forward(sequence, seq_lens, params):
    """sequence: (T, B) int32; seq_lens: (B,) int32. Returns (final_hidden, logits)."""
    embed_w = params["embed"]                       # (V, D)
    x = embed_w[sequence]                           # (T, B, D) — embedding gather (XLA glue)
    # TODO(synk): nn.Dropout is identity at inference; training-mode dropout omitted.
    T, B, D = x.shape
    H = params["whr"].shape[0]
    C = params["wout"].shape[1]

    # ---- lane/sublane-aligned padded sizes ----
    Bp = _round_up(B, 8)
    Hp = _round_up(H, 128)
    Cp = _round_up(C, 128)

    if Bp != B:
        x = jnp.pad(x, ((0, 0), (0, Bp - B), (0, 0)))
    lens = jnp.pad(seq_lens.astype(jnp.int32), (0, Bp - B))   # padded rows: len=0, never advance
    lens_col = lens.reshape(Bp, 1)

    def pad2(w, r, c):
        return jnp.pad(w, ((0, r - w.shape[0]), (0, c - w.shape[1])))

    def pad1(v, n):
        return jnp.pad(v, (0, n - v.shape[0]))

    # ---- Fused, padded input-side weights/bias (b_hr, b_hz folded in; b_hn stays in-kernel) ----
    wi_cat = jnp.concatenate([pad2(params["wir"].T, D, Hp),
                              pad2(params["wiz"].T, D, Hp),
                              pad2(params["win"].T, D, Hp)], axis=1)          # (D, 3Hp)
    bi_cat = jnp.concatenate([pad1(params["bir"] + params["bhr"], Hp),
                              pad1(params["biz"] + params["bhz"], Hp),
                              pad1(params["bin"], Hp)], axis=0).reshape(1, 3 * Hp)

    # ---- Fused, padded hidden-side weights; separate n-gate hidden bias ----
    wh_cat = jnp.concatenate([pad2(params["whr"].T, Hp, Hp),
                              pad2(params["whz"].T, Hp, Hp),
                              pad2(params["whn"].T, Hp, Hp)], axis=1)         # (Hp, 3Hp)
    bhn = pad1(params["bhn"], Hp).reshape(1, Hp)

    # ---- Padded classifier weights ----
    wout = pad2(params["wout"], Hp, Cp)                                       # (Hp, Cp)
    bout = pad1(params["bout"], Cp).reshape(1, Cp)

    # ---- Hoisted input-side projection: one big tiled matmul over all timesteps ----
    # TODO(synk): when V << T*B, precompute a (V, 3Hp) gate table and gather instead.
    gi = linear_pallas(x.reshape(T * Bp, D), wi_cat, bi_cat).reshape(T, Bp, 3 * Hp)
    # TODO(synk): cast gi (and wh_cat) to bf16 on v6e/v7x; kept f32 here for the 1e-5 check.

    # ---- Time chunking (restores auto-pipelining, caps VMEM at 2 x Tc x Bp x 3Hp) ----
    Tc = min(T, 128)                     # v7x (64 MiB VMEM): use ~half of this
    Tp = _round_up(T, Tc)
    if Tp != T:
        gi = jnp.pad(gi, ((0, Tp - T), (0, 0), (0, 0)))   # padded steps masked out by lens

    max_len = jnp.minimum(jnp.max(lens), T).astype(jnp.int32).reshape(1)      # SMEM scalar

    # Explicit VMEM budget (double-buffered inputs + resident outputs + margin).
    gi_chunk_bytes = Tc * Bp * 3 * Hp * 4
    fixed_bytes = (Hp * 3 * Hp + Hp * Cp + Bp * Hp + Bp * Cp + 4 * Hp + Cp + Bp * 128) * 4
    vmem_limit = int(min(100 * 1024 * 1024,
                         max(16 * 1024 * 1024,
                             2 * gi_chunk_bytes + 2 * fixed_bytes + (2 << 20))))

    grid_spec = pltpu.PrefetchScalarGridSpec(
        num_scalar_prefetch=1,                        # max_len lands in SMEM
        grid=(Tp // Tc,),
        in_specs=[
            pl.BlockSpec((Tc, Bp, 3 * Hp), lambda i, mlen: (i, 0, 0)),   # Gi chunk (pipelined)
            pl.BlockSpec((Bp, 1), lambda i, mlen: (0, 0)),               # seq_lens (invariant)
            pl.BlockSpec((Hp, 3 * Hp), lambda i, mlen: (0, 0)),          # Wh fused (invariant)
            pl.BlockSpec((1, Hp), lambda i, mlen: (0, 0)),               # b_hn
            pl.BlockSpec((Hp, Cp), lambda i, mlen: (0, 0)),              # W_out
            pl.BlockSpec((1, Cp), lambda i, mlen: (0, 0)),               # b_out
        ],
        out_specs=[
            pl.BlockSpec((Bp, Hp), lambda i, mlen: (0, 0)),              # h (resident carry)
            pl.BlockSpec((Bp, Cp), lambda i, mlen: (0, 0)),              # logits
        ],
    )

    h_p, logit_p = pl.pallas_call(
        gru_recurrence_kernel,
        out_shape=(jax.ShapeDtypeStruct((Bp, Hp), jnp.float32),
                   jax.ShapeDtypeStruct((Bp, Cp), jnp.float32)),
        grid_spec=grid_spec,
        compiler_params=pltpu.CompilerParams(
            dimension_semantics=("arbitrary",),       # carried h across T chunks
            vmem_limit_bytes=vmem_limit),
    )(max_len, gi, lens_col, wh_cat, bhn, wout, bout)

    # TODO(synk): on v7x add a leading "parallel" grid axis over B-chunks (2 TensorCores).
    return h_p[:B, :H], logit_p[:B, :C]


def reference_forward(sequence, seq_lens, params):
    """Pure-JAX reference (same semantics) for a correctness check."""
    x = params["embed"][sequence]                   # (T, B, D)
    T, B, _ = x.shape
    H = params["whr"].shape[0]
    h = jnp.zeros((B, H), jnp.float32)

    def step(h, inp):
        x_t, t = inp
        r = jax.nn.sigmoid(x_t @ params["wir"].T + params["bir"] + h @ params["whr"].T + params["bhr"])
        z = jax.nn.sigmoid(x_t @ params["wiz"].T + params["biz"] + h @ params["whz"].T + params["bhz"])
        n = jnp.tanh(x_t @ params["win"].T + params["bin"] + r * (h @ params["whn"].T + params["bhn"]))
        h_new = (1.0 - z) * n + z * h
        h = jnp.where((t < seq_lens)[:, None], h_new, h)
        return h, None

    h, _ = jax.lax.scan(step, h, (x, jnp.arange(T)))
    logit = h @ params["wout"] + params["bout"]
    return h, logit


def init_params(key, V, D, H, C):
    """Deterministic PyTorch-like init: U(-1/sqrt(H), 1/sqrt(H)) for GRU/Linear, N(0,1) embedding."""
    ks = jax.random.split(key, 16)
    k = 1.0 / jnp.sqrt(H)
    u = lambda kk, shape: jax.random.uniform(kk, shape, jnp.float32, -k, k)
    return {
        "embed": jax.random.normal(ks[0], (V, D), jnp.float32),
        "wir": u(ks[1], (H, D)), "wiz": u(ks[2], (H, D)), "win": u(ks[3], (H, D)),
        "whr": u(ks[4], (H, H)), "whz": u(ks[5], (H, H)), "whn": u(ks[6], (H, H)),
        "bir": u(ks[7], (H,)), "biz": u(ks[8], (H,)), "bin": u(ks[9], (H,)),
        "bhr": u(ks[10], (H,)), "bhz": u(ks[11], (H,)), "bhn": u(ks[12], (H,)),
        "wout": u(ks[13], (H, C)),   # stored as W_out^T, i.e. (output_size, C)
        "bout": u(ks[14], (C,)),
    }


if __name__ == "__main__":
    # args implied by the module: vocab_size, embed_dim, hidden_dim, layer_num=1,
    # class_num, batch_size; bidirectional=False.
    V, D, H, C = 100, 32, 32, 4
    T, B = 8, 2

    key = jax.random.PRNGKey(0)
    kp, ks = jax.random.split(key)
    params = init_params(kp, V, D, H, C)

    sequence = jax.random.randint(ks, (T, B), 0, V, dtype=jnp.int32)
    seq_lens = jnp.array([8, 5], dtype=jnp.int32)   # sorted descending (pack_padded_sequence)

    h_out, logit = gru_forward(sequence, seq_lens, params)
    jax.block_until_ready((h_out, logit))

    h_ref, logit_ref = reference_forward(sequence, seq_lens, params)
    assert jnp.allclose(h_out, h_ref, atol=1e-5, rtol=1e-5)
    assert jnp.allclose(logit, logit_ref, atol=1e-5, rtol=1e-5)

    print("KERNEL_OK")
</pallas_src>

<mosaic_0001>
module attributes {stable_mosaic.version = 11 : i64} {
  func.func @_linear_kernel(%arg0: i32, %arg1: memref<64x32xf32, #tpu.memory_space<vmem>>, %arg2: memref<32x384xf32, #tpu.memory_space<vmem>>, %arg3: memref<1x384xf32, #tpu.memory_space<vmem>>, %arg4: memref<64x384xf32, #tpu.memory_space<vmem>>) attributes {dimension_semantics = [#tpu.dimension_semantics<parallel>], iteration_bounds = array<i64: 1>, scalar_prefetch = 0 : i64, scratch_operands = 0 : i64, tpu.core_type = #tpu.core_type<tc>, window_params = [{transform_indices = @transform_0, window_bounds = array<i64: 64, 32>}, {pipeline_mode = #tpu.pipeline_mode<synchronous>, transform_indices = @transform_1, window_bounds = array<i64: 32, 384>}, {pipeline_mode = #tpu.pipeline_mode<synchronous>, transform_indices = @transform_2, window_bounds = array<i64: 1, 384>}, {transform_indices = @transform_3, window_bounds = array<i64: 64, 384>}]} {
    %c0 = arith.constant 0 : index
    %c0_0 = arith.constant 0 : index
    %0 = vector.load %arg1[%c0, %c0_0] : memref<64x32xf32, #tpu.memory_space<vmem>>, vector<64x32xf32>
    %c0_1 = arith.constant 0 : index
    %c0_2 = arith.constant 0 : index
    %1 = vector.load %arg2[%c0_1, %c0_2] : memref<32x384xf32, #tpu.memory_space<vmem>>, vector<32x384xf32>
    %cst = arith.constant dense<0.000000e+00> : vector<64x384xf32>
    %2 = tpu.matmul %0, %1, %cst {dimension_numbers = #tpu.dot_dimension_numbers<[1], [0], [0], [1], [0, 0, 1, 1], [], []>} : vector<64x32xf32>, vector<32x384xf32>, vector<64x384xf32> -> vector<64x384xf32>
    %c0_3 = arith.constant 0 : index
    %c0_4 = arith.constant 0 : index
    %3 = vector.load %arg3[%c0_3, %c0_4] : memref<1x384xf32, #tpu.memory_space<vmem>>, vector<1x384xf32>
    %4 = vector.broadcast %3 : vector<1x384xf32> to vector<64x384xf32>
    %5 = arith.addf %2, %4 : vector<64x384xf32>
    %c0_5 = arith.constant 0 : index
    %c0_6 = arith.constant 0 : index
    %6 = vector.load %arg4[%c0_5, %c0_6] : memref<64x384xf32, #tpu.memory_space<vmem>>, vector<64x384xf32>
    tpu.vector_store %arg4[%c0_5, %c0_6], %5 {strides = array<i32>} : memref<64x384xf32, #tpu.memory_space<vmem>>, vector<64x384xf32>,
    return
  }
  func.func @transform_0(%arg0: i32) -> (i32, i32) {
    %c0_i32 = arith.constant 0 : i32
    %c0_i32_0 = arith.constant 0 : i32
    return %arg0, %c0_i32 : i32, i32
  }
  func.func @transform_1(%arg0: i32) -> (i32, i32) {
    %c0_i32 = arith.constant 0 : i32
    %c0_i32_0 = arith.constant 0 : i32
    %c0_i32_1 = arith.constant 0 : i32
    return %c0_i32, %c0_i32_0 : i32, i32
  }
  func.func @transform_2(%arg0: i32) -> (i32, i32) {
    %c0_i32 = arith.constant 0 : i32
    %c0_i32_0 = arith.constant 0 : i32
    %c0_i32_1 = arith.constant 0 : i32
    return %c0_i32, %c0_i32_0 : i32, i32
  }
  func.func @transform_3(%arg0: i32) -> (i32, i32) {
    %c0_i32 = arith.constant 0 : i32
    %c0_i32_0 = arith.constant 0 : i32
    return %arg0, %c0_i32 : i32, i32
  }
}

</mosaic_0001>

<bundles_post_ra>
// kernel: tpu_custom_call.1
= control target key start
LH: loop header
LB: loop body
LE: loop exit
PB: predicated region body
PF: predicated region fallthrough
CT: control target
= control target key end

     0   :  { %8 = vsyncpa [#allocation3], 0  ;;  %s484_s0 = inlined_call_operand.vmem [shape: f32[64,32], index: 0, kind: input, shape index: {}]   ;;  %s485_s1 = inlined_call_operand.vmem [shape: f32[32,384], index: 1, kind: input, shape index: {}]   ;;  %s486_s2 = inlined_call_operand.hbm [shape: f32[1,384], index: 2, kind: input, shape index: {}]   ;;  %s487_s3 = inlined_call_operand.hbm [shape: f32[64,384], index: 3, kind: output, shape index: {}]  }
   0x1   :  { %9 = vsyncpa [#allocation4], 0  ;;  %s19_s14 = sshll.u32 %s486_s2, 4  ;;  %s340_s15 = smov [#allocation2]   ;;  %s20_s14 = int_to_ptr.hbm [resolvable:$true] %s19_s14 }
   0x2   :  { %s21_s16 = sshll.u32 %s340_s15, 4  ;;  %s22_s16 = int_to_ptr.vmem [resolvable:$true] %s21_s16 }
   0x3   :  { %24 = dma.hbm_to_vmem [thread:$0]  %s20_s14, 48, %s22_s16, [#allocation3]  }
   0x4   :  { %336 = dma.done.wait [#allocation3], 48  }
   0x5   :  { %337 = vsyncadd [#allocation3], 4294967248  ;;  %v46_v0 = vld [vmem:[%s485_s1 + $0x48] sm:$0xff]  ;;  %v48_v1 = vld [vmem:[%s485_s1 + $0x58] sm:$0xff]  ;;  %vm57_vm0 = vcmask 261120   ;;  %s235_s30 = sshll.u32 %s487_s3, 4  ;;  %s236_s30 = int_to_ptr.hbm [resolvable:$true] %s235_s30 }
   0x6   :  { %v43_v2 = vld [vmem:[%s485_s1 + $0x30] sm:$0xff]  ;;  %272 = vmatpush.msra.mxu3 %v46_v0  ;;  %176 = vmatpush.msra.mxu2 %v48_v1  ;;  %v45_v3 = vld [vmem:[%s485_s1 + $0x40] sm:$0xff]  ;;  %v40_v4 = vld [vmem:[%s485_s1 + $0x18] sm:$0xff]  ;;  %s342_s4 = smov 384   ;;  %s343_s5 = smov 24  }
   0x7   :  { %v42_v5 = vld [vmem:[%s485_s1 + $0x28] sm:$0xff]  ;;  %94 = vmatpush.msra.mxu0 %v46_v0  ;;  %v47_v6 = vld [vmem:[%s485_s1 + $0x50] sm:$0xff]  ;;  %v44_v7 = vld [vmem:[%s485_s1 + $0x38] sm:$0xff] }
   0x8   :  { %273 = vmatpush.msra.mxu3 %v43_v2  ;;  %177 = vmatpush.msra.mxu2 %v45_v3  ;;  %v37_v8 = vld [vmem:[%s485_s1] sm:$0xff]  ;;  %v39_v9 = vld [vmem:[%s485_s1 + $0x10] sm:$0xff]  ;;  %v38_v13 = vld [vmem:[%s485_s1 + $0x8] sm:$0xff] }
   0x9   :  { %135 = vmatpush.msra.mxu1 %v47_v6  ;;  %95 = vmatpush.msra.mxu0 %v43_v2  ;;  %v35_v10 = vld [vmem:[%s484_s0 + $0x30] sm:$0xff]  ;;  %v29_v11 = vld [vmem:[%s484_s0] sm:$0xff]  ;;  %v36_v14 = vld [vmem:[%s484_s0 + $0x38] sm:$0xff] }
   0xa   :  { %274 = vmatpush.msra.mxu3 %v40_v4  ;;  %178 = vmatpush.msra.mxu2 %v42_v5  ;;  %v41_v12 = vld [vmem:[%s485_s1 + $0x20] sm:$0xff]  ;;  %v30_v15 = vld [vmem:[%s484_s0 + $0x8] sm:$0xff]  ;;  %v31_v16 = vld [vmem:[%s484_s0 + $0x10] sm:$0xff] }
   0xb   :  { %136 = vmatpush.msra.mxu1 %v44_v7  ;;  %96 = vmatpush.msra.mxu0 %v40_v4  ;;  %v32_v17 = vld [vmem:[%s484_s0 + $0x18] sm:$0xff]  ;;  %v33_v18 = vld [vmem:[%s484_s0 + $0x20] sm:$0xff]  ;;  %v34_v19 = vld [vmem:[%s484_s0 + $0x28] sm:$0xff]  ;;  %s341_s0 = smov [#allocation5]  }
   0xc   :  { %275 = vmatpush.msra.mxu3 %v37_v8  ;;  %179 = vmatpush.msra.mxu2 %v39_v9  ;;  %v49_v20 = vld [vmem:[#allocation2] sm:$0x7]  ;;  %s233_s27 = sshll.u32 %s341_s0, 4  ;;  %s234_s27 = int_to_ptr.vmem [resolvable:$true] %s233_s27 }
   0xd   :  { %254 = vmatmul.msk.f32.vlgmr.msra.gmra.mxu3 %vm57_vm0, %v35_v10  ;;  %264 = vmatmul.msk.f32.vlgmr.msra.gmra.mxu2 %vm57_vm0, %v29_v11  ;;  %v451_v21 = vperm.slane %v49_v20, 0  ;;  %v453_v22 = vperm.slane %v49_v20, 1  ;;  %v455_v23 = vperm.slane %v49_v20, 2 }
   0xe   :  { %276 = vmatpush.msrb.mxu3 %v47_v6  ;;  %137 = vmatpush.msra.mxu1 %v41_v12 }
   0xf   :  { %97 = vmatpush.msra.mxu0 %v37_v8 }
  0x10   :  { %277 = vmatpush.msrb.mxu3 %v44_v7  ;;  %138 = vmatpush.msra.mxu1 %v38_v13 }
  0x11   :  { %248 = vmatmul.msk.f32.vlgmr.msra.gmra.mxu0 %vm57_vm0, %v29_v11  ;;  %256 = vmatmul.msk.f32.vlgmr.msra.gmra.mxu1 %vm57_vm0, %v29_v11 }
  0x12   :  { %278 = vmatpush.msrb.mxu3 %v41_v12 }
  0x14   :  { %279 = vmatpush.msrb.mxu3 %v38_v13 }
  0x15   :  { %255 = vmatmul.msk.f32.gmra.mxu3 %vm57_vm0, %v36_v14  ;;  %265 = vmatmul.msk.f32.gmra.mxu2 %vm57_vm0, %v30_v15 }
  0x16   :  { %280 = vmatpush.msra.mxu3 %v48_v1 }
  0x18   :  { %281 = vmatpush.msra.mxu3 %v45_v3 }
  0x19   :  { %249 = vmatmul.msk.f32.gmra.mxu0 %vm57_vm0, %v30_v15  ;;  %257 = vmatmul.msk.f32.gmra.mxu1 %vm57_vm0, %v30_v15 }
  0x1a   :  { %282 = vmatpush.msra.mxu3 %v42_v5 }
  0x1c   :  { %283 = vmatpush.msra.mxu3 %v39_v9 }
  0x1d   :  { %262 = vmatmul.msk.f32.vlgmr.msrb.gmra.mxu3 %vm57_vm0, %v35_v10  ;;  %266 = vmatmul.msk.f32.gmra.mxu2 %vm57_vm0, %v31_v16 }
  0x21   :  { %250 = vmatmul.msk.f32.gmra.mxu0 %vm57_vm0, %v31_v16  ;;  %258 = vmatmul.msk.f32.gmra.mxu1 %vm57_vm0, %v31_v16 }
  0x25   :  { %263 = vmatmul.msk.f32.gmra.mxu3 %vm57_vm0, %v36_v14  ;;  %267 = vmatmul.msk.f32.gmra.mxu2 %vm57_vm0, %v32_v17 }
  0x29   :  { %251 = vmatmul.msk.f32.gmra.mxu0 %vm57_vm0, %v32_v17  ;;  %259 = vmatmul.msk.f32.gmra.mxu1 %vm57_vm0, %v32_v17 }
  0x2d   :  { %268 = vmatmul.msk.f32.gmra.mxu2 %vm57_vm0, %v33_v18  ;;  %270 = vmatmul.msk.f32.vlgmr.msra.gmra.mxu3 %vm57_vm0, %v35_v10 }
  0x31   :  { %252 = vmatmul.msk.f32.gmra.mxu0 %vm57_vm0, %v33_v18  ;;  %260 = vmatmul.msk.f32.gmra.mxu1 %vm57_vm0, %v33_v18 }
  0x35   :  { %269 = vmatmul.msk.f32.gmra.mxu2 %vm57_vm0, %v34_v19  ;;  %271 = vmatmul.msk.f32.gmra.mxu3 %vm57_vm0, %v36_v14 }
  0x39   :  { %253 = vmatmul.msk.f32.gmra.mxu0 %vm57_vm0, %v34_v19  ;;  %261 = vmatmul.msk.f32.gmra.mxu1 %vm57_vm0, %v34_v19 }
  0x8e   :  { %v99_v24 = vpop.f32.mrf.mxu0  ;;  %v140_v25 = vpop.f32.mrf.mxu1 }
  0x8f   :  { %v100_v26 = vadd.f32 %v99_v24, %v451_v21  ;;  %v141_v27 = vadd.f32 %v140_v25, %v453_v22 }
  0x90   :  { %v117_v28 = vpop.f32.mrf.mxu3  ;;  %v181_v29 = vpop.f32.mrf.mxu2 }
  0x91   :  { %205 = vst [vmem:[#allocation5] sm:$0xff] %v100_v26  ;;  %v118_v30 = vadd.f32 %v117_v28, %v451_v21  ;;  %v182_v31 = vadd.f32 %v181_v29, %v455_v23 }
  0x92   :  { %206 = vst [vmem:[#allocation5 + $0x8] sm:$0xff] %v141_v27 }
  0x93   :  { %223 = vst [vmem:[#allocation5 + $0x90] sm:$0xff] %v118_v30 }
  0x94   :  { %207 = vst [vmem:[#allocation5 + $0x10] sm:$0xff] %v182_v31 }
  0x96   :  { %v102_v32 = vpop.f32.mrf.mxu0  ;;  %v143_v33 = vpop.f32.mrf.mxu1 }
  0x97   :  { %v103_v34 = vadd.f32 %v102_v32, %v451_v21  ;;  %v144_v35 = vadd.f32 %v143_v33, %v453_v22 }
  0x98   :  { %v120_v36 = vpop.f32.mrf.mxu3  ;;  %v184_v37 = vpop.f32.mrf.mxu2 }
  0x99   :  { %208 = vst [vmem:[#allocation5 + $0x18] sm:$0xff] %v103_v34  ;;  %v121_v38 = vadd.f32 %v120_v36, %v451_v21  ;;  %v185_v39 = vadd.f32 %v184_v37, %v455_v23 }
  0x9a   :  { %209 = vst [vmem:[#allocation5 + $0x20] sm:$0xff] %v144_v35 }
  0x9b   :  { %226 = vst [vmem:[#allocation5 + $0xa8] sm:$0xff] %v121_v38 }
  0x9c   :  { %210 = vst [vmem:[#allocation5 + $0x28] sm:$0xff] %v185_v39 }
  0x9e   :  { %v105_v40 = vpop.f32.mrf.mxu0  ;;  %v146_v41 = vpop.f32.mrf.mxu1 }
  0x9f   :  { %v106_v42 = vadd.f32 %v105_v40, %v451_v21  ;;  %v147_v43 = vadd.f32 %v146_v41, %v453_v22 }
  0xa0   :  { %v158_v44 = vpop.f32.mrf.mxu3  ;;  %v187_v45 = vpop.f32.mrf.mxu2 }
  0xa1   :  { %211 = vst [vmem:[#allocation5 + $0x30] sm:$0xff] %v106_v42  ;;  %v159_v46 = vadd.f32 %v158_v44, %v453_v22  ;;  %v188_v47 = vadd.f32 %v187_v45, %v455_v23 }
  0xa2   :  { %212 = vst [vmem:[#allocation5 + $0x38] sm:$0xff] %v147_v43 }
  0xa3   :  { %224 = vst [vmem:[#allocation5 + $0x98] sm:$0xff] %v159_v46 }
  0xa4   :  { %213 = vst [vmem:[#allocation5 + $0x40] sm:$0xff] %v188_v47 }
  0xa6   :  { %v108_v48 = vpop.f32.mrf.mxu0  ;;  %v149_v49 = vpop.f32.mrf.mxu1 }
  0xa7   :  { %v109_v50 = vadd.f32 %v108_v48, %v451_v21  ;;  %v150_v51 = vadd.f32 %v149_v49, %v453_v22 }
  0xa8   :  { %v161_v52 = vpop.f32.mrf.mxu3  ;;  %v190_v53 = vpop.f32.mrf.mxu2 }
  0xa9   :  { %214 = vst [vmem:[#allocation5 + $0x48] sm:$0xff] %v109_v50  ;;  %v162_v54 = vadd.f32 %v161_v52, %v453_v22  ;;  %v191_v55 = vadd.f32 %v190_v53, %v455_v23 }
  0xaa   :  { %215 = vst [vmem:[#allocation5 + $0x50] sm:$0xff] %v150_v51 }
  0xab   :  { %227 = vst [vmem:[#allocation5 + $0xb0] sm:$0xff] %v162_v54 }
  0xac   :  { %216 = vst [vmem:[#allocation5 + $0x58] sm:$0xff] %v191_v55 }
  0xae   :  { %v111_v56 = vpop.f32.mrf.mxu0  ;;  %v152_v57 = vpop.f32.mrf.mxu1 }
  0xaf   :  { %v112_v58 = vadd.f32 %v111_v56, %v451_v21  ;;  %v153_v59 = vadd.f32 %v152_v57, %v453_v22 }
  0xb0   :  { %v193_v60 = vpop.f32.mrf.mxu2  ;;  %v199_v61 = vpop.f32.mrf.mxu3 }
  0xb1   :  { %217 = vst [vmem:[#allocation5 + $0x60] sm:$0xff] %v112_v58  ;;  %v194_v62 = vadd.f32 %v193_v60, %v455_v23  ;;  %v200_v63 = vadd.f32 %v199_v61, %v455_v23 }
  0xb2   :  { %218 = vst [vmem:[#allocation5 + $0x68] sm:$0xff] %v153_v59 }
  0xb3   :  { %219 = vst [vmem:[#allocation5 + $0x70] sm:$0xff] %v194_v62 }
  0xb4   :  { %225 = vst [vmem:[#allocation5 + $0xa0] sm:$0xff] %v200_v63 }
  0xb6   :  { %v114_v0 = vpop.f32.mrf.mxu0  ;;  %v155_v1 = vpop.f32.mrf.mxu1 }
  0xb7   :  { %v115_v2 = vadd.f32 %v114_v0, %v451_v21  ;;  %v156_v3 = vadd.f32 %v155_v1, %v453_v22 }
  0xb8   :  { %v196_v4 = vpop.f32.mrf.mxu2  ;;  %v202_v5 = vpop.f32.mrf.mxu3 }
  0xb9   :  { %220 = vst [vmem:[#allocation5 + $0x78] sm:$0xff] %v115_v2  ;;  %v197_v6 = vadd.f32 %v196_v4, %v455_v23  ;;  %v203_v7 = vadd.f32 %v202_v5, %v455_v23 }
  0xba   :  { %221 = vst [vmem:[#allocation5 + $0x80] sm:$0xff] %v156_v3 }
  0xbb   :  { %222 = vst [vmem:[#allocation5 + $0x88] sm:$0xff] %v197_v6 }
  0xbc   :  { %228 = vst [vmem:[#allocation5 + $0xb8] sm:$0xff] %v203_v7 }
  0xbd   :  { %241 = dma.vmem_to_hbm [thread:$0]  %s234_s27, 3072, %s236_s30, [#allocation4], %s342_s4, %s342_s4, %s343_s5  }
  0xbe   :  { %338 = dma.done.wait [#allocation4], 3072  }
  0xbf   :  { %339 = vsyncadd [#allocation4], 4294964224 }
  0xc0   :  { %246 = vsyncpa [#allocation3], 1 }
  0xc1   :  { %247 = vsyncpa [#allocation4], 1 }

</bundles_post_ra>
